<compile_context>
chip_gen: v6e
topology: v6e:2x2x1
jax: 0.10.0
libtpu: 0.0.40
codegen_flags: <defaults>
</compile_context>

<pallas_src>
import math
import jax
import jax.numpy as jnp
from jax.experimental import pallas as pl
from jax.experimental.pallas import tpu as pltpu

# ---- problem sizes (small, consistent with the module) ----------------------
B = 2          # batch
S = 8          # seq_len
D_MODEL = 32   # d_model
NUM_HEADS = 4
DEPTH = D_MODEL // NUM_HEADS
FC_DIM = 64
LN_EPS = 1e-5


def _layernorm(x, gamma, beta, eps=LN_EPS):
    mu = jnp.mean(x, axis=-1, keepdims=True)
    var = jnp.mean((x - mu) ** 2, axis=-1, keepdims=True)
    return (x - mu) * jax.lax.rsqrt(var + eps) * gamma + beta


def attention_block_kernel(
    x_ref,                    # (B, S, D)
    wqkv_ref, bqkv_ref,       # (H*B, D, 3*depth), (H*B, 1, 3*depth)
    wo_ref, bo_ref,           # (H*B, depth, D),   (1, D)
    g1_ref, be1_ref,          # (1, D)
    wf1_ref, bf1_ref,         # (D, FC), (1, FC)
    wf2_ref, bf2_ref,         # (FC, D), (1, D)
    g2_ref, be2_ref,          # (1, D)
    o_ref,                    # (B, S, D)
):
    Bsz, Ssz, Dm = x_ref.shape
    HB = wqkv_ref.shape[0]
    H = HB // Bsz
    depth = wqkv_ref.shape[2] // 3

    x = x_ref[...]                                   # (B, S, D)
    x2 = x.reshape(Bsz * Ssz, Dm)                    # residual stream (B*S, D)

    # ---- fused, head-batched Q/K/V projection (one MXU op, one bias add) ----
    # replicate x over heads on a leading dim (n = h*B + b); weights arrive
    # already laid out per (head, batch) so no head-split relayout is needed.
    x_hb = jnp.broadcast_to(x[None], (H, Bsz, Ssz, Dm)).reshape(HB, Ssz, Dm)
    qkv = jnp.einsum("nsd,nde->nse", x_hb, wqkv_ref[...],
                     preferred_element_type=jnp.float32) + bqkv_ref[...]
    q = qkv[..., 0:depth]                            # (H*B, S, depth)
    k = qkv[..., depth:2 * depth]
    v = qkv[..., 2 * depth:3 * depth]

    # ---- scaled dot-product attention, batched over (head*batch) ----
    scale = 1.0 / math.sqrt(depth)
    scores = jnp.einsum("nqd,nkd->nqk", q, k,
                        preferred_element_type=jnp.float32) * scale
    m = jnp.max(scores, axis=-1, keepdims=True)
    e = jnp.exp(scores - m)
    denom = jnp.sum(e, axis=-1, keepdims=True)
    p = e * pl.reciprocal(denom, approx=True)        # softmax over keys (EUP)
    ctx = jnp.einsum("nqk,nkd->nqd", p, v,
                     preferred_element_type=jnp.float32)   # (H*B, S, depth)

    # ---- output projection folded per head, then summed over heads ----
    o_heads = jnp.einsum("nsd,ndo->nso", ctx, wo_ref[...],
                         preferred_element_type=jnp.float32)  # (H*B, S, D)
    attn = (o_heads.reshape(H, Bsz, Ssz, Dm).sum(axis=0)
            .reshape(Bsz * Ssz, Dm) + bo_ref[...])
    # (dropout after output projection == identity in eval mode)

    # ---- add & norm 1 ----
    add_norm1 = _layernorm(attn + x2, g1_ref[...], be1_ref[...])

    # ---- feed-forward: Linear -> ReLU -> (Dropout) -> Linear -> ReLU -> (Dropout) ----
    h1 = jnp.dot(add_norm1, wf1_ref[...],
                 preferred_element_type=jnp.float32) + bf1_ref[...]
    h1 = jnp.maximum(h1, 0.0)
    h2 = jnp.dot(h1, wf2_ref[...],
                 preferred_element_type=jnp.float32) + bf2_ref[...]
    h2 = jnp.maximum(h2, 0.0)

    # ---- add & norm 2 ----
    out = _layernorm(add_norm1 + h2, g2_ref[...], be2_ref[...])
    o_ref[...] = out.reshape(Bsz, Ssz, Dm).astype(o_ref.dtype)


def attention_block(x, params):
    """x: (B, S, D) float32. params: dict of weights (see init_params)."""
    Bsz, Ssz, Dm = x.shape
    H = NUM_HEADS
    depth = Dm // H

    # --- wrapper-side (pure JAX) weight re-layout: head axis -> leading dim ---
    def per_head_out(w):                 # (D, D) -> (H, D, depth)  (out cols head-major)
        return w.reshape(Dm, H, depth).transpose(1, 0, 2)

    w_qkv_h = jnp.concatenate(
        [per_head_out(params["wq"]), per_head_out(params["wk"]),
         per_head_out(params["wv"])], axis=-1)                    # (H, D, 3*depth)
    b_qkv_h = jnp.concatenate(
        [params["bq"].reshape(H, 1, depth), params["bk"].reshape(H, 1, depth),
         params["bv"].reshape(H, 1, depth)], axis=-1)             # (H, 1, 3*depth)
    wo_h = params["wo"].reshape(H, depth, Dm)                     # (H, depth, D)

    # replicate per-head params across the batch so the kernel runs a single
    # (H*B)-batched contraction (n = h*B + b); a few KiB, done once.
    w_qkv_hb = jnp.repeat(w_qkv_h, Bsz, axis=0)
    b_qkv_hb = jnp.repeat(b_qkv_h, Bsz, axis=0)
    wo_hb = jnp.repeat(wo_h, Bsz, axis=0)

    args = [
        x, w_qkv_hb, b_qkv_hb, wo_hb, params["bo"],
        params["ln1_g"], params["ln1_b"],
        params["wf1"], params["bf1"], params["wf2"], params["bf2"],
        params["ln2_g"], params["ln2_b"],
    ]

    # single kernel invocation: no grid, every operand fully resident in VMEM.
    vmem = lambda: pl.BlockSpec(memory_space=pltpu.MemorySpace.VMEM)
    return pl.pallas_call(
        attention_block_kernel,
        out_shape=jax.ShapeDtypeStruct((Bsz, Ssz, Dm), jnp.float32),
        in_specs=[vmem() for _ in args],
        out_specs=vmem(),
    )(*args)


def init_params(key):
    """Deterministic synthetic weights. Linear weights stored as (in, out)."""
    keys = jax.random.split(key, 16)

    def w(k, shape, scale=0.05):
        return jax.random.normal(k, shape, dtype=jnp.float32) * scale

    return {
        "wq": w(keys[0], (D_MODEL, D_MODEL)), "bq": w(keys[1], (1, D_MODEL)),
        "wk": w(keys[2], (D_MODEL, D_MODEL)), "bk": w(keys[3], (1, D_MODEL)),
        "wv": w(keys[4], (D_MODEL, D_MODEL)), "bv": w(keys[5], (1, D_MODEL)),
        "wo": w(keys[6], (D_MODEL, D_MODEL)), "bo": w(keys[7], (1, D_MODEL)),
        "ln1_g": jnp.ones((1, D_MODEL), jnp.float32),
        "ln1_b": jnp.zeros((1, D_MODEL), jnp.float32),
        "wf1": w(keys[8], (D_MODEL, FC_DIM)), "bf1": w(keys[9], (1, FC_DIM)),
        "wf2": w(keys[10], (FC_DIM, D_MODEL)), "bf2": w(keys[11], (1, D_MODEL)),
        "ln2_g": jnp.ones((1, D_MODEL), jnp.float32),
        "ln2_b": jnp.zeros((1, D_MODEL), jnp.float32),
    }


def attention_block_ref(x, p):
    """Pure-JAX reference mirroring the PyTorch forward (pH=None, eval mode)."""
    Bsz, Ssz, Dsz = x.shape

    def lin(a, w, b):
        return a @ w + b

    q = lin(x, p["wq"], p["bq"]).reshape(Bsz, Ssz, NUM_HEADS, DEPTH).transpose(0, 2, 1, 3)
    k = lin(x, p["wk"], p["bk"]).reshape(Bsz, Ssz, NUM_HEADS, DEPTH).transpose(0, 2, 1, 3)
    v = lin(x, p["wv"], p["bv"]).reshape(Bsz, Ssz, NUM_HEADS, DEPTH).transpose(0, 2, 1, 3)
    att = jnp.einsum("bhqd,bhkd->bhqk", q, k) / math.sqrt(DEPTH)
    att = jax.nn.softmax(att, axis=-1)
    att = jnp.einsum("bhqk,bhkd->bhqd", att, v)
    att = att.transpose(0, 2, 1, 3).reshape(Bsz, Ssz, Dsz)
    att = lin(att, p["wo"], p["bo"])

    def ln(a, g, b):
        mu = jnp.mean(a, axis=-1, keepdims=True)
        var = jnp.mean((a - mu) ** 2, axis=-1, keepdims=True)
        return (a - mu) * jax.lax.rsqrt(var + LN_EPS) * g + b

    an1 = ln(att + x, p["ln1_g"], p["ln1_b"])
    fcx = jnp.maximum(lin(jnp.maximum(lin(an1, p["wf1"], p["bf1"]), 0.0),
                          p["wf2"], p["bf2"]), 0.0)
    return ln(an1 + fcx, p["ln2_g"], p["ln2_b"])


if __name__ == "__main__":
    key = jax.random.PRNGKey(0)
    kx, kp = jax.random.split(key)
    x = jax.random.normal(kx, (B, S, D_MODEL), dtype=jnp.float32)
    params = init_params(kp)

    out = attention_block(x, params)
    out = jax.block_until_ready(out)

    ref = attention_block_ref(x, params)
    assert out.shape == (B, S, D_MODEL)
    # pl.reciprocal(approx=True) in the softmax denominator -> ~1e-3 level
    # differences vs. the exact-divide reference (per review), hence 2e-3.
    assert jnp.allclose(out, ref, atol=2e-3, rtol=2e-3), "mismatch vs reference"

    # TODO(synk): pH != None branch of MultiheadAttention.forward is not
    # implemented (module default is pH=None; the pH path relies on a
    # shape-dependent repeat that is ill-defined for general pH).
    print("KERNEL_OK")
</pallas_src>

<mosaic_0001>
module attributes {stable_mosaic.version = 11 : i64} {
  func.func @attention_block_kernel(%arg0: memref<2x8x32xf32, #tpu.memory_space<vmem>>, %arg1: memref<8x32x24xf32, #tpu.memory_space<vmem>>, %arg2: memref<8x1x24xf32, #tpu.memory_space<vmem>>, %arg3: memref<8x8x32xf32, #tpu.memory_space<vmem>>, %arg4: memref<1x32xf32, #tpu.memory_space<vmem>>, %arg5: memref<1x32xf32, #tpu.memory_space<vmem>>, %arg6: memref<1x32xf32, #tpu.memory_space<vmem>>, %arg7: memref<32x64xf32, #tpu.memory_space<vmem>>, %arg8: memref<1x64xf32, #tpu.memory_space<vmem>>, %arg9: memref<64x32xf32, #tpu.memory_space<vmem>>, %arg10: memref<1x32xf32, #tpu.memory_space<vmem>>, %arg11: memref<1x32xf32, #tpu.memory_space<vmem>>, %arg12: memref<1x32xf32, #tpu.memory_space<vmem>>, %arg13: memref<2x8x32xf32, #tpu.memory_space<vmem>>) attributes {dimension_semantics = [], scalar_prefetch = 0 : i64, scratch_operands = 0 : i64, tpu.core_type = #tpu.core_type<tc>} {
    %c0 = arith.constant 0 : index
    %c0_0 = arith.constant 0 : index
    %c0_1 = arith.constant 0 : index
    %0 = vector.load %arg0[%c0, %c0_0, %c0_1] : memref<2x8x32xf32, #tpu.memory_space<vmem>>, vector<2x8x32xf32>
    %1 = vector.shape_cast %0 : vector<2x8x32xf32> to vector<16x32xf32>
    %2 = vector.shape_cast %0 : vector<2x8x32xf32> to vector<1x2x8x32xf32>
    %3 = vector.shape_cast %2 : vector<1x2x8x32xf32> to vector<1x2x8x32xf32>
    %4 = vector.broadcast %3 : vector<1x2x8x32xf32> to vector<4x2x8x32xf32>
    %5 = vector.shape_cast %4 : vector<4x2x8x32xf32> to vector<8x8x32xf32>
    %c0_2 = arith.constant 0 : index
    %c0_3 = arith.constant 0 : index
    %c0_4 = arith.constant 0 : index
    %6 = vector.load %arg1[%c0_2, %c0_3, %c0_4] : memref<8x32x24xf32, #tpu.memory_space<vmem>>, vector<8x32x24xf32>
    "tpu.trace_start"() <{level = 10 : i32, message = "nsd,nde->nse"}> : () -> ()
    %cst = arith.constant dense<0.000000e+00> : vector<8x8x24xf32>
    %7 = tpu.matmul %5, %6, %cst {dimension_numbers = #tpu.dot_dimension_numbers<[2], [1], [1], [2], [0, 0, 0, 1, 1, 2], [0], [0]>} : vector<8x8x32xf32>, vector<8x32x24xf32>, vector<8x8x24xf32> -> vector<8x8x24xf32>
    "tpu.trace_stop"() : () -> ()
    %c0_5 = arith.constant 0 : index
    %c0_6 = arith.constant 0 : index
    %c0_7 = arith.constant 0 : index
    %8 = vector.load %arg2[%c0_5, %c0_6, %c0_7] : memref<8x1x24xf32, #tpu.memory_space<vmem>>, vector<8x1x24xf32>
    %9 = vector.broadcast %8 : vector<8x1x24xf32> to vector<8x8x24xf32>
    %10 = arith.addf %7, %9 : vector<8x8x24xf32>
    %11 = vector.extract_strided_slice %10 {offsets = [0, 0, 0], sizes = [8, 8, 8], strides = [1, 1, 1]} : vector<8x8x24xf32> to vector<8x8x8xf32>
    %12 = vector.extract_strided_slice %10 {offsets = [0, 0, 8], sizes = [8, 8, 8], strides = [1, 1, 1]} : vector<8x8x24xf32> to vector<8x8x8xf32>
    %13 = vector.extract_strided_slice %10 {offsets = [0, 0, 16], sizes = [8, 8, 8], strides = [1, 1, 1]} : vector<8x8x24xf32> to vector<8x8x8xf32>
    "tpu.trace_start"() <{level = 10 : i32, message = "nqd,nkd->nqk"}> : () -> ()
    %cst_8 = arith.constant dense<0.000000e+00> : vector<8x8x8xf32>
    %14 = tpu.matmul %11, %12, %cst_8 {dimension_numbers = #tpu.dot_dimension_numbers<[2], [2], [1], [1], [0, 0, 0, 1, 1, 1], [0], [0]>} : vector<8x8x8xf32>, vector<8x8x8xf32>, vector<8x8x8xf32> -> vector<8x8x8xf32>
    "tpu.trace_stop"() : () -> ()
    %cst_9 = arith.constant 0.353553385 : f32
    %15 = vector.broadcast %cst_9 : f32 to vector<8x8x8xf32>
    %16 = arith.mulf %14, %15 : vector<8x8x8xf32>
    %cst_10 = arith.constant dense<0xFF800000> : vector<8x8xf32>
    %17 = vector.multi_reduction <maximumf>, %16, %cst_10 [2] : vector<8x8x8xf32> to vector<8x8xf32>
    %18 = vector.shape_cast %17 : vector<8x8xf32> to vector<8x8x1xf32>
    %19 = vector.broadcast %18 : vector<8x8x1xf32> to vector<8x8x8xf32>
    %20 = arith.subf %16, %19 : vector<8x8x8xf32>
    %21 = math.exp %20 : vector<8x8x8xf32>
    %cst_11 = arith.constant dense<0.000000e+00> : vector<8x8xf32>
    %22 = vector.multi_reduction <add>, %21, %cst_11 [2] : vector<8x8x8xf32> to vector<8x8xf32>
    %23 = vector.shape_cast %22 : vector<8x8xf32> to vector<8x8x1xf32>
    %24 = tpu.reciprocal %23 {approx = true} : vector<8x8x1xf32> -> vector<8x8x1xf32>
    %25 = vector.broadcast %24 : vector<8x8x1xf32> to vector<8x8x8xf32>
    %26 = arith.mulf %21, %25 : vector<8x8x8xf32>
    "tpu.trace_start"() <{level = 10 : i32, message = "nqk,nkd->nqd"}> : () -> ()
    %cst_12 = arith.constant dense<0.000000e+00> : vector<8x8x8xf32>
    %27 = tpu.matmul %26, %13, %cst_12 {dimension_numbers = #tpu.dot_dimension_numbers<[2], [1], [1], [2], [0, 0, 0, 1, 1, 2], [0], [0]>} : vector<8x8x8xf32>, vector<8x8x8xf32>, vector<8x8x8xf32> -> vector<8x8x8xf32>
    "tpu.trace_stop"() : () -> ()
    %c0_13 = arith.constant 0 : index
    %c0_14 = arith.constant 0 : index
    %c0_15 = arith.constant 0 : index
    %28 = vector.load %arg3[%c0_13, %c0_14, %c0_15] : memref<8x8x32xf32, #tpu.memory_space<vmem>>, vector<8x8x32xf32>
    "tpu.trace_start"() <{level = 10 : i32, message = "nsd,ndo->nso"}> : () -> ()
    %cst_16 = arith.constant dense<0.000000e+00> : vector<8x8x32xf32>
    %29 = tpu.matmul %27, %28, %cst_16 {dimension_numbers = #tpu.dot_dimension_numbers<[2], [1], [1], [2], [0, 0, 0, 1, 1, 2], [0], [0]>} : vector<8x8x8xf32>, vector<8x8x32xf32>, vector<8x8x32xf32> -> vector<8x8x32xf32>
    "tpu.trace_stop"() : () -> ()
    %30 = vector.shape_cast %29 : vector<8x8x32xf32> to vector<4x2x8x32xf32>
    %cst_17 = arith.constant dense<0.000000e+00> : vector<2x8x32xf32>
    %31 = vector.multi_reduction <add>, %30, %cst_17 [0] : vector<4x2x8x32xf32> to vector<2x8x32xf32>
    %32 = vector.shape_cast %31 : vector<2x8x32xf32> to vector<16x32xf32>
    %c0_18 = arith.constant 0 : index
    %c0_19 = arith.constant 0 : index
    %33 = vector.load %arg4[%c0_18, %c0_19] : memref<1x32xf32, #tpu.memory_space<vmem>>, vector<1x32xf32>
    %34 = vector.broadcast %33 : vector<1x32xf32> to vector<16x32xf32>
    %35 = arith.addf %32, %34 : vector<16x32xf32>
    %36 = arith.addf %35, %1 : vector<16x32xf32>
    %c0_20 = arith.constant 0 : index
    %c0_21 = arith.constant 0 : index
    %37 = vector.load %arg5[%c0_20, %c0_21] : memref<1x32xf32, #tpu.memory_space<vmem>>, vector<1x32xf32>
    %c0_22 = arith.constant 0 : index
    %c0_23 = arith.constant 0 : index
    %38 = vector.load %arg6[%c0_22, %c0_23] : memref<1x32xf32, #tpu.memory_space<vmem>>, vector<1x32xf32>
    %cst_24 = arith.constant dense<0.000000e+00> : vector<16xf32>
    %39 = vector.multi_reduction <add>, %36, %cst_24 [1] : vector<16x32xf32> to vector<16xf32>
    %40 = vector.shape_cast %39 : vector<16xf32> to vector<16x1xf32>
    %cst_25 = arith.constant 3.200000e+01 : f32
    %41 = vector.broadcast %cst_25 : f32 to vector<16x1xf32>
    %42 = arith.divf %40, %41 : vector<16x1xf32>
    %43 = vector.broadcast %42 : vector<16x1xf32> to vector<16x32xf32>
    %44 = arith.subf %36, %43 : vector<16x32xf32>
    %45 = arith.mulf %44, %44 : vector<16x32xf32>
    %cst_26 = arith.constant dense<0.000000e+00> : vector<16xf32>
    %46 = vector.multi_reduction <add>, %45, %cst_26 [1] : vector<16x32xf32> to vector<16xf32>
    %47 = vector.shape_cast %46 : vector<16xf32> to vector<16x1xf32>
    %cst_27 = arith.constant 3.200000e+01 : f32
    %48 = vector.broadcast %cst_27 : f32 to vector<16x1xf32>
    %49 = arith.divf %47, %48 : vector<16x1xf32>
    %50 = vector.broadcast %42 : vector<16x1xf32> to vector<16x32xf32>
    %51 = arith.subf %36, %50 : vector<16x32xf32>
    %cst_28 = arith.constant 9.99999974E-6 : f32
    %52 = vector.broadcast %cst_28 : f32 to vector<16x1xf32>
    %53 = arith.addf %49, %52 : vector<16x1xf32>
    %54 = math.rsqrt %53 : vector<16x1xf32>
    %55 = vector.broadcast %54 : vector<16x1xf32> to vector<16x32xf32>
    %56 = arith.mulf %51, %55 : vector<16x32xf32>
    %57 = vector.broadcast %37 : vector<1x32xf32> to vector<16x32xf32>
    %58 = arith.mulf %56, %57 : vector<16x32xf32>
    %59 = vector.broadcast %38 : vector<1x32xf32> to vector<16x32xf32>
    %60 = arith.addf %58, %59 : vector<16x32xf32>
    %c0_29 = arith.constant 0 : index
    %c0_30 = arith.constant 0 : index
    %61 = vector.load %arg7[%c0_29, %c0_30] : memref<32x64xf32, #tpu.memory_space<vmem>>, vector<32x64xf32>
    %cst_31 = arith.constant dense<0.000000e+00> : vector<16x64xf32>
    %62 = tpu.matmul %60, %61, %cst_31 {dimension_numbers = #tpu.dot_dimension_numbers<[1], [0], [0], [1], [0, 0, 1, 1], [], []>} : vector<16x32xf32>, vector<32x64xf32>, vector<16x64xf32> -> vector<16x64xf32>
    %c0_32 = arith.constant 0 : index
    %c0_33 = arith.constant 0 : index
    %63 = vector.load %arg8[%c0_32, %c0_33] : memref<1x64xf32, #tpu.memory_space<vmem>>, vector<1x64xf32>
    %64 = vector.broadcast %63 : vector<1x64xf32> to vector<16x64xf32>
    %65 = arith.addf %62, %64 : vector<16x64xf32>
    %cst_34 = arith.constant 0.000000e+00 : f32
    %66 = vector.broadcast %cst_34 : f32 to vector<16x64xf32>
    %67 = arith.maximumf %65, %66 : vector<16x64xf32>
    %c0_35 = arith.constant 0 : index
    %c0_36 = arith.constant 0 : index
    %68 = vector.load %arg9[%c0_35, %c0_36] : memref<64x32xf32, #tpu.memory_space<vmem>>, vector<64x32xf32>
    %cst_37 = arith.constant dense<0.000000e+00> : vector<16x32xf32>
    %69 = tpu.matmul %67, %68, %cst_37 {dimension_numbers = #tpu.dot_dimension_numbers<[1], [0], [0], [1], [0, 0, 1, 1], [], []>} : vector<16x64xf32>, vector<64x32xf32>, vector<16x32xf32> -> vector<16x32xf32>
    %c0_38 = arith.constant 0 : index
    %c0_39 = arith.constant 0 : index
    %70 = vector.load %arg10[%c0_38, %c0_39] : memref<1x32xf32, #tpu.memory_space<vmem>>, vector<1x32xf32>
    %71 = vector.broadcast %70 : vector<1x32xf32> to vector<16x32xf32>
    %72 = arith.addf %69, %71 : vector<16x32xf32>
    %cst_40 = arith.constant 0.000000e+00 : f32
    %73 = vector.broadcast %cst_40 : f32 to vector<16x32xf32>
    %74 = arith.maximumf %72, %73 : vector<16x32xf32>
    %75 = arith.addf %60, %74 : vector<16x32xf32>
    %c0_41 = arith.constant 0 : index
    %c0_42 = arith.constant 0 : index
    %76 = vector.load %arg11[%c0_41, %c0_42] : memref<1x32xf32, #tpu.memory_space<vmem>>, vector<1x32xf32>
    %c0_43 = arith.constant 0 : index
    %c0_44 = arith.constant 0 : index
    %77 = vector.load %arg12[%c0_43, %c0_44] : memref<1x32xf32, #tpu.memory_space<vmem>>, vector<1x32xf32>
    %cst_45 = arith.constant dense<0.000000e+00> : vector<16xf32>
    %78 = vector.multi_reduction <add>, %75, %cst_45 [1] : vector<16x32xf32> to vector<16xf32>
    %79 = vector.shape_cast %78 : vector<16xf32> to vector<16x1xf32>
    %cst_46 = arith.constant 3.200000e+01 : f32
    %80 = vector.broadcast %cst_46 : f32 to vector<16x1xf32>
    %81 = arith.divf %79, %80 : vector<16x1xf32>
    %82 = vector.broadcast %81 : vector<16x1xf32> to vector<16x32xf32>
    %83 = arith.subf %75, %82 : vector<16x32xf32>
    %84 = arith.mulf %83, %83 : vector<16x32xf32>
    %cst_47 = arith.constant dense<0.000000e+00> : vector<16xf32>
    %85 = vector.multi_reduction <add>, %84, %cst_47 [1] : vector<16x32xf32> to vector<16xf32>
    %86 = vector.shape_cast %85 : vector<16xf32> to vector<16x1xf32>
    %cst_48 = arith.constant 3.200000e+01 : f32
    %87 = vector.broadcast %cst_48 : f32 to vector<16x1xf32>
    %88 = arith.divf %86, %87 : vector<16x1xf32>
    %89 = vector.broadcast %81 : vector<16x1xf32> to vector<16x32xf32>
    %90 = arith.subf %75, %89 : vector<16x32xf32>
    %cst_49 = arith.constant 9.99999974E-6 : f32
    %91 = vector.broadcast %cst_49 : f32 to vector<16x1xf32>
    %92 = arith.addf %88, %91 : vector<16x1xf32>
    %93 = math.rsqrt %92 : vector<16x1xf32>
    %94 = vector.broadcast %93 : vector<16x1xf32> to vector<16x32xf32>
    %95 = arith.mulf %90, %94 : vector<16x32xf32>
    %96 = vector.broadcast %76 : vector<1x32xf32> to vector<16x32xf32>
    %97 = arith.mulf %95, %96 : vector<16x32xf32>
    %98 = vector.broadcast %77 : vector<1x32xf32> to vector<16x32xf32>
    %99 = arith.addf %97, %98 : vector<16x32xf32>
    %100 = vector.shape_cast %99 : vector<16x32xf32> to vector<2x8x32xf32>
    %c0_50 = arith.constant 0 : index
    %c0_51 = arith.constant 0 : index
    %c0_52 = arith.constant 0 : index
    %101 = vector.load %arg13[%c0_50, %c0_51, %c0_52] : memref<2x8x32xf32, #tpu.memory_space<vmem>>, vector<2x8x32xf32>
    tpu.vector_store %arg13[%c0_50, %c0_51, %c0_52], %100 {strides = array<i32>} : memref<2x8x32xf32, #tpu.memory_space<vmem>>, vector<2x8x32xf32>,
    return
  }
}

</mosaic_0001>

<bundles_post_ra>
// kernel: tpu_custom_call.1
= control target key start
LH: loop header
LB: loop body
LE: loop exit
PB: predicated region body
PF: predicated region fallthrough
CT: control target
= control target key end

     0   :  { %v3412_v2 = vmov 0.0   ;;  %vm135_vm0 = vcmask 261120   ;;  %vm3413_vm1 = vmmov 0   ;;  %s3981_s0 = inlined_call_operand.vmem [shape: f32[2,8,32], index: 0, kind: input, shape index: {}]   ;;  %s3982_s1 = inlined_call_operand.vmem [shape: f32[8,32,24], index: 1, kind: input, shape index: {}]   ;;  %s3983_s2 = inlined_call_operand.vmem [shape: f32[8,1,24], index: 2, kind: input, shape index: {}]   ;;  %s3984_s3 = inlined_call_operand.vmem [shape: f32[8,8,32], index: 3, kind: input, shape index: {}]   ;;  %s3985_s4 = inlined_call_operand.vmem [shape: f32[1,32], index: 4, kind: input, shape index: {}]   ;;  %s3986_s5 = inlined_call_operand.vmem [shape: f32[1,32], index: 5, kind: input, shape index: {}]   ;;  %s3987_s6 = inlined_call_operand.vmem [shape: f32[1,32], index: 6, kind: input, shape index: {}]   ;;  %s3988_s7 = inlined_call_operand.vmem [shape: f32[32,64], index: 7, kind: input, shape index: {}]   ;;  %s3989_s8 = inlined_call_operand.vmem [shape: f32[1,64], index: 8, kind: input, shape index: {}]   ;;  %s3990_s9 = inlined_call_operand.vmem [shape: f32[64,32], index: 9, kind: input, shape index: {}]   ;;  %s3991_s10 = inlined_call_operand.vmem [shape: f32[1,32], index: 10, kind: input, shape index: {}]   ;;  %s3992_s11 = inlined_call_operand.vmem [shape: f32[1,32], index: 11, kind: input, shape index: {}]   ;;  %s3993_s12 = inlined_call_operand.vmem [shape: f32[1,32], index: 12, kind: input, shape index: {}]   ;;  %s3994_s13 = inlined_call_operand.hbm [shape: f32[2,8,32], index: 13, kind: output, shape index: {}]  }
   0x1   :  { %v50_v0 = vld [vmem:[%s3982_s1 + $0x18] sm:$0xff]  ;;  %3105 = vmatprep.subr.mxu0 %v3412_v2  ;;  %3116 = vmatprep.subr.mxu1 %v3412_v2  ;;  %v49_v3 = vld [vmem:[%s3982_s1 + $0x10] sm:$0xff]  ;;  %v48_v5 = vld [vmem:[%s3982_s1 + $0x8] sm:$0xff] }
   0x2   :  { %v54_v1 = vld [vmem:[%s3982_s1 + $0x38] sm:$0xff]  ;;  %v53_v4 = vld [vmem:[%s3982_s1 + $0x30] sm:$0xff]  ;;  %3106 = vmatpush3.msra.mxu0 %v50_v0  ;;  %v52_v6 = vld [vmem:[%s3982_s1 + $0x28] sm:$0xff]  ;;  %3113 = vmatprep.mubr.msk.f32.mxu0 %vm3413_vm1, %v3412_v2 }
   0x3   :  { %3117 = vmatpush3.msra.mxu1 %v54_v1  ;;  %3107 = vmatprep.subr.mxu0 %v3412_v2  ;;  %v47_v7 = vld [vmem:[%s3982_s1] sm:$0xff]  ;;  %v3531_v10 = vld [vmem:[%s3981_s0 + $0x8] sm:$0xff]  ;;  %v58_v11 = vld [vmem:[%s3982_s1 + $0x58] sm:$0xff] }
   0x4   :  { %3118 = vmatprep.subr.mxu1 %v3412_v2  ;;  %3108 = vmatpush3.msra.mxu0 %v49_v3  ;;  %v51_v8 = vld [vmem:[%s3982_s1 + $0x20] sm:$0xff]  ;;  %v62_v12 = vld [vmem:[%s3982_s1 + $0x78] sm:$0xff]  ;;  %v57_v13 = vld [vmem:[%s3982_s1 + $0x50] sm:$0xff] }
   0x5   :  { %3119 = vmatpush3.msra.mxu1 %v53_v4  ;;  %3109 = vmatprep.subr.mxu0 %v3412_v2  ;;  %v3522_v9 = vld [vmem:[%s3981_s0] sm:$0xff]  ;;  %v61_v14 = vld [vmem:[%s3982_s1 + $0x70] sm:$0xff] }
   0x6   :  { %3120 = vmatprep.subr.mxu1 %v3412_v2  ;;  %3110 = vmatpush3.msra.mxu0 %v48_v5 }
   0x7   :  { %3121 = vmatpush3.msra.mxu1 %v52_v6  ;;  %3111 = vmatprep.subr.mxu0 %v3412_v2 }
   0x8   :  { %3122 = vmatprep.subr.mxu1 %v3412_v2  ;;  %3112 = vmatpush3.msra.mxu0 %v47_v7 }
   0x9   :  { %3123 = vmatpush3.msra.mxu1 %v51_v8  ;;  %3114 = vmatmul.mubr.msk.f32.vlgmr.msra.gmra.mxu0 %vm135_vm0, %v3522_v9 }
   0xa   :  { %3124 = vmatprep.mubr.msk.f32.mxu1 %vm3413_vm1, %v3412_v2  ;;  %3127 = vmatprep.subr.mxu0 %v3412_v2 }
   0xb   :  { %3138 = vmatprep.subr.mxu1 %v3412_v2  ;;  %3125 = vmatmul.mubr.msk.f32.vlgmr.msra.gmra.mxu1 %vm135_vm0, %v3531_v10 }
   0xc   :  { %18 = vsyncpa [#allocation3], 0  ;;  %3128 = vmatpush3.msra.mxu0 %v58_v11  ;;  %3139 = vmatpush3.msra.mxu1 %v62_v12  ;;  %v56_v15 = vld [vmem:[%s3982_s1 + $0x48] sm:$0xff]  ;;  %v55_v17 = vld [vmem:[%s3982_s1 + $0x40] sm:$0xff]  ;;  %s3414_s25 = smov 120   ;;  %vm705_vm2 = vcmask 64512  }
   0xd   :  { %3129 = vmatprep.subr.mxu0 %v3412_v2  ;;  %3140 = vmatprep.subr.mxu1 %v3412_v2  ;;  %v60_v16 = vld [vmem:[%s3982_s1 + $0x68] sm:$0xff]  ;;  %v59_v18 = vld [vmem:[%s3982_s1 + $0x60] sm:$0xff]  ;;  %v66_v19 = vld [vmem:[%s3982_s1 + $0x98] sm:$0xff]  ;;  %vm2794_vm3 = vcmask 523264   ;;  %s3416_s23 = smov [#allocation2]  }
   0xe   :  { %3130 = vmatpush3.msra.mxu0 %v57_v13  ;;  %3141 = vmatpush3.msra.mxu1 %v61_v14  ;;  %v70_v20 = vld [vmem:[%s3982_s1 + $0xb8] sm:$0xff]  ;;  %v65_v21 = vld [vmem:[%s3982_s1 + $0x90] sm:$0xff]  ;;  %v64_v23 = vld [vmem:[%s3982_s1 + $0x88] sm:$0xff]  ;;  %s2931_s24 = sshll.u32 %s3416_s23, 4  ;;  %s2932_s24 = int_to_ptr.vmem [resolvable:$true] %s2931_s24 }
   0xf   :  { %3131 = vmatprep.subr.mxu0 %v3412_v2  ;;  %3142 = vmatprep.subr.mxu1 %v3412_v2  ;;  %v69_v22 = vld [vmem:[%s3982_s1 + $0xb0] sm:$0xff]  ;;  %v68_v24 = vld [vmem:[%s3982_s1 + $0xa8] sm:$0xff]  ;;  %v63_v25 = vld [vmem:[%s3982_s1 + $0x80] sm:$0xff]  ;;  %p3395_p1 = scmp.lt.s32.totalorder %s2932_s24, %s2932_s24 }
  0x10   :  { %3132 = vmatpush3.msra.mxu0 %v56_v15  ;;  %3143 = vmatpush3.msra.mxu1 %v60_v16  ;;  %v67_v26 = vld [vmem:[%s3982_s1 + $0xa0] sm:$0xff]  ;;  %v74_v27 = vld [vmem:[%s3982_s1 + $0xd8] sm:$0xff]  ;;  %v73_v29 = vld [vmem:[%s3982_s1 + $0xd0] sm:$0xff] }
  0x11   :  { %3133 = vmatprep.subr.mxu0 %v3412_v2  ;;  %3144 = vmatprep.subr.mxu1 %v3412_v2  ;;  %v78_v28 = vld [vmem:[%s3982_s1 + $0xf8] sm:$0xff]  ;;  %v77_v30 = vld [vmem:[%s3982_s1 + $0xf0] sm:$0xff]  ;;  %v72_v31 = vld [vmem:[%s3982_s1 + $0xc8] sm:$0xff] }
  0x12   :  { %3134 = vmatpush3.msra.mxu0 %v55_v17  ;;  %3135 = vmatprep.mubr.msk.f32.mxu0 %vm3413_vm1, %v3412_v2  ;;  %v76_v32 = vld [vmem:[%s3982_s1 + $0xe8] sm:$0xff]  ;;  %v71_v33 = vld [vmem:[%s3982_s1 + $0xc0] sm:$0xff] }
  0x13   :  { %3145 = vmatpush3.msra.mxu1 %v59_v18  ;;  %3136 = vmatmul.mubr.msk.f32.vlgmr.msra.gmra.mxu0 %vm135_vm0, %v3522_v9  ;;  %v75_v34 = vld [vmem:[%s3982_s1 + $0xe0] sm:$0xff] }
  0x14   :  { %3146 = vmatprep.mubr.msk.f32.mxu1 %vm3413_vm1, %v3412_v2  ;;  %3149 = vmatprep.subr.mxu0 %v3412_v2  ;;  %v2942_v35 = vld [vmem:[%s3983_s2] ss:$0 sm:$0xff]  ;;  %v2943_v37 = vld [vmem:[%s3983_s2 + $0x1] ss:$0 sm:$0xff]  ;;  %v2944_v43 = vld [vmem:[%s3983_s2 + $0x2] ss:$0 sm:$0xff] }
  0x15   :  { %3160 = vmatprep.subr.mxu1 %v3412_v2  ;;  %3147 = vmatmul.mubr.msk.f32.vlgmr.msra.gmra.mxu1 %vm135_vm0, %v3531_v10  ;;  %v2945_v45 = vld [vmem:[%s3983_s2 + $0x3] ss:$0 sm:$0xff]  ;;  %v2946_v51 = vld [vmem:[%s3983_s2 + $0x4] ss:$0 sm:$0xff]  ;;  %v2947_v52 = vld [vmem:[%s3983_s2 + $0x5] ss:$0 sm:$0xff] }
  0x16   :  { %3150 = vmatpush3.msra.mxu0 %v66_v19  ;;  %3161 = vmatpush3.msra.mxu1 %v70_v20  ;;  %v2948_v59 = vld [vmem:[%s3983_s2 + $0x6] ss:$0 sm:$0xff]  ;;  %v2949_v60 = vld [vmem:[%s3983_s2 + $0x7] ss:$0 sm:$0xff]  ;;  %s3415_s2 = smov 112  }
  0x17   :  { %3151 = vmatprep.subr.mxu0 %v3412_v2  ;;  %3162 = vmatprep.subr.mxu1 %v3412_v2 }
  0x18   :  { %3152 = vmatpush3.msra.mxu0 %v65_v21  ;;  %3163 = vmatpush3.msra.mxu1 %v69_v22 }
  0x19   :  { %3153 = vmatprep.subr.mxu0 %v3412_v2  ;;  %3164 = vmatprep.subr.mxu1 %v3412_v2 }
  0x1a   :  { %3154 = vmatpush3.msra.mxu0 %v64_v23  ;;  %3165 = vmatpush3.msra.mxu1 %v68_v24 }
  0x1b   :  { %3155 = vmatprep.subr.mxu0 %v3412_v2  ;;  %3166 = vmatprep.subr.mxu1 %v3412_v2 }
  0x1c   :  { %3156 = vmatpush3.msra.mxu0 %v63_v25  ;;  %3157 = vmatprep.mubr.msk.f32.mxu0 %vm3413_vm1, %v3412_v2 }
  0x1d   :  { %3167 = vmatpush3.msra.mxu1 %v67_v26  ;;  %3168 = vmatprep.mubr.msk.f32.mxu1 %vm3413_vm1, %v3412_v2 }
  0x1e   :  { %3158 = vmatmul.mubr.msk.f32.vlgmr.msra.gmra.mxu0 %vm135_vm0, %v3522_v9  ;;  %3169 = vmatmul.mubr.msk.f32.vlgmr.msra.gmra.mxu1 %vm135_vm0, %v3531_v10 }
  0x1f   :  { %3171 = vmatprep.subr.mxu0 %v3412_v2  ;;  %3182 = vmatprep.subr.mxu1 %v3412_v2 }
  0x20   :  { %3172 = vmatpush3.msra.mxu0 %v74_v27  ;;  %3183 = vmatpush3.msra.mxu1 %v78_v28 }
  0x21   :  { %3173 = vmatprep.subr.mxu0 %v3412_v2  ;;  %3184 = vmatprep.subr.mxu1 %v3412_v2 }
  0x22   :  { %3174 = vmatpush3.msra.mxu0 %v73_v29  ;;  %3185 = vmatpush3.msra.mxu1 %v77_v30 }
  0x23   :  { %3175 = vmatprep.subr.mxu0 %v3412_v2  ;;  %3186 = vmatprep.subr.mxu1 %v3412_v2 }
  0x24   :  { %3176 = vmatpush3.msra.mxu0 %v72_v31  ;;  %3187 = vmatpush3.msra.mxu1 %v76_v32 }
  0x25   :  { %3177 = vmatprep.subr.mxu0 %v3412_v2  ;;  %3188 = vmatprep.subr.mxu1 %v3412_v2 }
  0x26   :  { %3178 = vmatpush3.msra.mxu0 %v71_v33  ;;  %3179 = vmatprep.mubr.msk.f32.mxu0 %vm3413_vm1, %v3412_v2 }
  0x27   :  { %3189 = vmatpush3.msra.mxu1 %v75_v34  ;;  %3190 = vmatprep.mubr.msk.f32.mxu1 %vm3413_vm1, %v3412_v2 }
  0x28   :  { %3180 = vmatmul.mubr.msk.f32.vlgmr.msra.gmra.mxu0 %vm135_vm0, %v3522_v9  ;;  %3191 = vmatmul.mubr.msk.f32.vlgmr.msra.gmra.mxu1 %vm135_vm0, %v3531_v10 }
  0x29   :  { %3193 = vmatprep.subr.mxu0 %v3412_v2  ;;  %3195 = vmatprep.mubr.msk.f32.mxu0 %vm3413_vm1, %v3412_v2 }
  0x2a   :  { %3208 = vmatprep.subr.mxu1 %v3412_v2  ;;  %3210 = vmatprep.mubr.msk.f32.mxu1 %vm3413_vm1, %v3412_v2 }
  0xc9   :  { %v205_v36 = vpop.f32.mrf.mxu0 }
  0xca   :  { %v3671_v38 = vadd.f32 %v2942_v35, %v205_v36 }
  0xcb   :  { %v3115_v39 = vpop.f32.mrf.mxu0  ;;  %v278_v40 = vpop.f32.mrf.mxu1 }
  0xcc   :  { %v3673_v41 = vadd.f32 %v2943_v37, %v278_v40  ;;  %703 = vrot.lane.b32.xlu0 %v3671_v38, %s3414_s25 }
  0xcd   :  { %v3126_v42 = vpop.f32.mrf.mxu1 }
  0xd0   :  { %781 = vrot.lane.b32.xlu0 %v3673_v41, %s3414_s25 }
  0xd3   :  { %v348_v44 = vpop.f32.mrf.mxu0 }
  0xd4   :  { %v3685_v46 = vadd.f32 %v2944_v43, %v348_v44 }
  0xd5   :  { %v3137_v47 = vpop.f32.mrf.mxu0  ;;  %v418_v48 = vpop.f32.mrf.mxu1 }
  0xd6   :  { %v3687_v49 = vadd.f32 %v2945_v45, %v418_v48  ;;  %858 = vrot.lane.b32.xlu1 %v3685_v46, %s3414_s25 }
  0xd7   :  { %v3148_v50 = vpop.f32.mrf.mxu1 }
  0xda   :  { %935 = vrot.lane.b32.xlu1 %v3687_v49, %s3414_s25 }
  0xde   :  { %v488_v53 = vpop.f32.mrf.mxu0  ;;  %v558_v54 = vpop.f32.mrf.mxu1 }
  0xdf   :  { %v3699_v55 = vadd.f32 %v2946_v51, %v488_v53  ;;  %v3701_v56 = vadd.f32 %v2947_v52, %v558_v54 }
  0xe0   :  { %v3159_v57 = vpop.f32.mrf.mxu0  ;;  %v3170_v58 = vpop.f32.mrf.mxu1 }
  0xe1   :  { %1089 = vrot.lane.b32.xlu1 %v3701_v56, %s3414_s25  ;;  %1012 = vrot.lane.b32.xlu0 %v3699_v55, %s3414_s25 }
  0xe8   :  { %v628_v61 = vpop.f32.mrf.mxu0  ;;  %v698_v62 = vpop.f32.mrf.mxu1 }
  0xe9   :  { %v3713_v63 = vadd.f32 %v2948_v59, %v628_v61  ;;  %v3715_v0 = vadd.f32 %v2949_v60, %v698_v62 }
  0xea   :  { %v3181_v1 = vpop.f32.mrf.mxu0  ;;  %v3192_v3 = vpop.f32.mrf.mxu1 }
  0xeb   :  { %1243 = vrot.lane.b32.xlu1 %v3715_v0, %s3414_s25  ;;  %1166 = vrot.lane.b32.xlu0 %v3713_v63, %s3414_s25  ;;  %s3390_s25 = scalar_lea.vmem %s2932_s24, 256 }
  0xec   :  { %p3391_p0 = scmp.ne.s32.totalorder %s2932_s24, %s3390_s25  ;;  %p3396_p2 = scmp.lt.s32.totalorder %s3390_s25, %s3390_s25 }
  0xee   :  { %p3397_p3 = por %p3396_p2, %p3395_p1 }
  0xf0   :  { %p3398_p4 = pnand %p3397_p3, %p3391_p0 }
 0x13e   :  { %v704_v4 = vpop.permute.xlu0 %703 }
 0x13f   :  { %3194 = vmatpush3.xpose.msk.msra.mxu0 %vm705_vm2, %v704_v4 }
 0x140   :  { %3198 = vmatprep.subr.mxu0 %v3412_v2 }
 0x142   :  { %3196 = vmatmul.mubr.msk.f32.vlgmr.msra.gmra.mxu0 %vm705_vm2, %v3671_v38  ;;  %v782_v5 = vpop.permute.xlu0 %781 }
 0x143   :  { %3199 = vmatpush3.xpose.msk.msra.mxu0 %vm705_vm2, %v782_v5  ;;  %3200 = vmatprep.mubr.msk.f32.mxu0 %vm3413_vm1, %v3412_v2 }
 0x144   :  { %3203 = vmatprep.subr.mxu0 %v3412_v2 }
 0x146   :  { %3201 = vmatmul.mubr.msk.f32.vlgmr.msra.gmra.mxu0 %vm705_vm2, %v3673_v41 }
 0x147   :  { %3205 = vmatprep.mubr.msk.f32.mxu0 %vm3413_vm1, %v3412_v2 }
 0x148   :  { %v859_v6 = vpop.permute.xlu1 %858 }
 0x149   :  { %3204 = vmatpush3.xpose.msk.msra.mxu0 %vm705_vm2, %v859_v6 }
 0x14a   :  { %3213 = vmatprep.subr.mxu0 %v3412_v2 }
 0x14c   :  { %3206 = vmatmul.mubr.msk.f32.vlgmr.msra.gmra.mxu0 %vm705_vm2, %v3685_v46  ;;  %v936_v7 = vpop.permute.xlu1 %935 }
 0x14d   :  { %3209 = vmatpush3.xpose.msk.msra.mxu1 %vm705_vm2, %v936_v7  ;;  %3215 = vmatprep.mubr.msk.f32.mxu0 %vm3413_vm1, %v3412_v2 }
 0x14e   :  { %3218 = vmatprep.subr.mxu1 %v3412_v2 }
 0x150   :  { %3211 = vmatmul.mubr.msk.f32.vlgmr.msra.gmra.mxu1 %vm705_vm2, %v3687_v49 }
 0x151   :  { %3220 = vmatprep.mubr.msk.f32.mxu1 %vm3413_vm1, %v3412_v2 }
 0x153   :  { %v1090_v8 = vpop.permute.xlu1 %1089  ;;  %v1013_v11 = vpop.permute.xlu0 %1012 }
 0x154   :  { %3214 = vmatpush3.xpose.msk.msra.mxu0 %vm705_vm2, %v1013_v11  ;;  %3219 = vmatpush3.xpose.msk.msra.mxu1 %vm705_vm2, %v1090_v8 }
 0x155   :  { %3228 = vmatprep.subr.mxu1 %v3412_v2  ;;  %3223 = vmatprep.subr.mxu0 %v3412_v2 }
 0x157   :  { %3216 = vmatmul.mubr.msk.f32.vlgmr.msra.gmra.mxu0 %vm705_vm2, %v3699_v55  ;;  %3221 = vmatmul.mubr.msk.f32.vlgmr.msra.gmra.mxu1 %vm705_vm2, %v3701_v56 }
 0x158   :  { %3225 = vmatprep.mubr.msk.f32.mxu0 %vm3413_vm1, %v3412_v2  ;;  %3230 = vmatprep.mubr.msk.f32.mxu1 %vm3413_vm1, %v3412_v2 }
 0x15d   :  { %v1244_v12 = vpop.permute.xlu1 %1243  ;;  %v1167_v13 = vpop.permute.xlu0 %1166 }
 0x15e   :  { %3224 = vmatpush3.xpose.msk.msra.mxu0 %vm705_vm2, %v1167_v13  ;;  %3229 = vmatpush3.xpose.msk.msra.mxu1 %vm705_vm2, %v1244_v12 }
 0x15f   :  { %3233 = vmatprep.subr.mxu0 %v3412_v2  ;;  %3238 = vmatprep.subr.mxu1 %v3412_v2 }
 0x161   :  { %3226 = vmatmul.mubr.msk.f32.vlgmr.msra.gmra.mxu0 %vm705_vm2, %v3713_v63  ;;  %3231 = vmatmul.mubr.msk.f32.vlgmr.msra.gmra.mxu1 %vm705_vm2, %v3715_v0 }
 0x162   :  { %3235 = vmatprep.mubr.msk.f32.mxu0 %vm3413_vm1, %v3412_v2  ;;  %3240 = vmatprep.mubr.msk.f32.mxu1 %vm3413_vm1, %v3412_v2 }
 0x202   :  { %v776_v14 = vpop.f32.mrf.mxu0 }
 0x203   :  { %v1319_v15 = vmul.f32 0.35355338, %v776_v14 }
 0x204   :  { %v3197_v16 = vpop.f32.mrf.mxu0 }
 0x205   :  { %v1327_v17 = vsel %vm705_vm2, %v1319_v15, -inf }
 0x206   :  { %1328 = vmax.xlane.f32.xlu0 %v1327_v17  ;;  %v853_v18 = vpop.f32.mrf.mxu0 }
 0x207   :  { %v1320_v19 = vmul.f32 0.35355338, %v853_v18 }
 0x208   :  { %v3202_v20 = vpop.f32.mrf.mxu0 }
 0x209   :  { %v1330_v21 = vsel %vm705_vm2, %v1320_v19, -inf }
 0x20a   :  { %1331 = vmax.xlane.f32.xlu1 %v1330_v21 }
 0x20c   :  { %v930_v22 = vpop.f32.mrf.mxu0 }
 0x20d   :  { %v1321_v23 = vmul.f32 0.35355338, %v930_v22 }
 0x20e   :  { %v3207_v24 = vpop.f32.mrf.mxu0 }
 0x20f   :  { %v1333_v25 = vsel %vm705_vm2, %v1321_v23, -inf }
 0x210   :  { %v1007_v26 = vpop.f32.mrf.mxu1  ;;  %1334 = vmax.xlane.f32.xlu0 %v1333_v25 }
 0x211   :  { %v1322_v27 = vmul.f32 0.35355338, %v1007_v26 }
 0x212   :  { %v3212_v28 = vpop.f32.mrf.mxu1 }
 0x213   :  { %v1336_v29 = vsel %vm705_vm2, %v1322_v27, -inf }
 0x214   :  { %1337 = vmax.xlane.f32.xlu0 %v1336_v29 }
 0x217   :  { %v1161_v30 = vpop.f32.mrf.mxu1  ;;  %v1084_v31 = vpop.f32.mrf.mxu0 }
 0x218   :  { %v1324_v32 = vmul.f32 0.35355338, %v1161_v30  ;;  %v1323_v33 = vmul.f32 0.35355338, %v1084_v31 }
 0x219   :  { %v3217_v34 = vpop.f32.mrf.mxu0  ;;  %v3222_v35 = vpop.f32.mrf.mxu1 }
 0x21a   :  { %v1342_v36 = vsel %vm705_vm2, %v1324_v32, -inf  ;;  %v1339_v37 = vsel %vm705_vm2, %v1323_v33, -inf }
 0x21b   :  { %1343 = vmax.xlane.f32.xlu0 %v1342_v36  ;;  %1340 = vmax.xlane.f32.xlu1 %v1339_v37 }
 0x221   :  { %v1238_v39 = vpop.f32.mrf.mxu0  ;;  %v1315_v40 = vpop.f32.mrf.mxu1 }
 0x222   :  { %v1325_v42 = vmul.f32 0.35355338, %v1238_v39  ;;  %v1326_v43 = vmul.f32 0.35355338, %v1315_v40 }
 0x223   :  { %v3227_v44 = vpop.f32.mrf.mxu0  ;;  %v3232_v45 = vpop.f32.mrf.mxu1 }
 0x224   :  { %v1348_v47 = vsel %vm705_vm2, %v1326_v43, -inf  ;;  %v1345_v48 = vsel %vm705_vm2, %v1325_v42, -inf }
 0x225   :  { %1349 = vmax.xlane.f32.xlu0 %v1348_v47  ;;  %1346 = vmax.xlane.f32.xlu1 %v1345_v48 }
 0x236   :  { %1415 = vrot.lane.b32.xlu1 %v3671_v38, %s3415_s2 }
 0x23a   :  { %1567 = vrot.lane.b32.xlu1 %v3685_v46, %s3415_s2 }
 0x23b   :  { %1491 = vrot.lane.b32.xlu0 %v3673_v41, %s3415_s2 }
 0x23e   :  { %1643 = vrot.lane.b32.xlu1 %v3687_v49, %s3415_s2 }
 0x23f   :  { %1719 = vrot.lane.b32.xlu0 %v3699_v55, %s3415_s2 }
 0x242   :  { %1795 = vrot.lane.b32.xlu1 %v3701_v56, %s3415_s2 }
 0x28f   :  { %v1329_v50 = vpop.xlane.xlu0 %1328 }
 0x290   :  { %v1351_v51 = vsub.f32 %v1319_v15, %v1329_v50 }
 0x292   :  { %v1359_v52 = vmul.f32 1.442695, %v1351_v51 }
 0x293   :  { %v1332_v53 = vpop.xlane.xlu1 %1331 }
 0x294   :  { %3350 = vpow2.f32 %v1359_v52  ;;  %v1352_v38 = vsub.f32 %v1320_v19, %v1332_v53 }
 0x296   :  { %v1361_v54 = vmul.f32 1.442695, %v1352_v38 }
 0x298   :  { %3352 = vpow2.f32 %v1361_v54 }
 0x299   :  { %v1335_v46 = vpop.xlane.xlu0 %1334 }
 0x29a   :  { %v1353_v57 = vsub.f32 %v1321_v23, %v1335_v46 }
 0x29c   :  { %v1363_v41 = vmul.f32 1.442695, %v1353_v57 }
 0x29d   :  { %v1338_v58 = vpop.xlane.xlu0 %1337 }
 0x29e   :  { %3354 = vpow2.f32 %v1363_v41  ;;  %v1354_v49 = vsub.f32 %v1322_v27, %v1338_v58 }
 0x2a0   :  { %v1365_v59 = vmul.f32 1.442695, %v1354_v49 }
 0x2a1   :  { %v3351_v60 = vpop.eup %3350 }
 0x2a2   :  { %3356 = vpow2.f32 %v1365_v59  ;;  %v1375_v55 = vsel %vm705_vm2, %v3351_v60, 0.0  ;;  %v2023_v59 = vld [vmem:[%s3984_s3] sm:$0xff] }
 0x2a3   :  { %1376 = vadd.xlane.f32.xlu1 %v1375_v55  ;;  %v2025_v55 = vld [vmem:[%s3984_s3 + $0x10] sm:$0xff] }
 0x2a4   :  { %v1344_v56 = vpop.xlane.xlu0 %1343  ;;  %v1341_v61 = vpop.xlane.xlu1 %1340 }
 0x2a5   :  { %v3353_v62 = vpop.eup %3352  ;;  %v1356_v1 = vsub.f32 %v1324_v32, %v1344_v56  ;;  %v1355_v3 = vsub.f32 %v1323_v33, %v1341_v61 }
 0x2a6   :  { %v1378_v4 = vsel %vm705_vm2, %v3353_v62, 0.0 }
 0x2a7   :  { %v1369_v5 = vmul.f32 1.442695, %v1356_v1  ;;  %v1367_v6 = vmul.f32 1.442695, %v1355_v3  ;;  %1379 = vadd.xlane.f32.xlu0 %v1378_v4  ;;  %v2027_v4 = vld [vmem:[%s3984_s3 + $0x20] sm:$0xff] }
 0x2a9   :  { %3358 = vpow2.f32 %v1369_v5 }
 0x2aa   :  { %3360 = vpow2.f32 %v1367_v6 }
 0x2ab   :  { %v3791_v7 = vpop.eup %3354 }
 0x2ac   :  { %v1381_v8 = vsel %vm705_vm2, %v3791_v7, 0.0 }
 0x2ad   :  { %1382 = vadd.xlane.f32.xlu1 %v1381_v8 }
 0x2ae   :  { %v1350_v11 = vpop.xlane.xlu0 %1349  ;;  %v1347_v12 = vpop.xlane.xlu1 %1346 }
 0x2af   :  { %v3795_v13 = vpop.eup %3356  ;;  %v1358_v14 = vsub.f32 %v1326_v43, %v1350_v11  ;;  %v1357_v15 = vsub.f32 %v1325_v42, %v1347_v12  ;;  %v2030_v12 = vld [vmem:[%s3984_s3 + $0x38] sm:$0xff] }
 0x2b0   :  { %v1384_v16 = vsel %vm705_vm2, %v3795_v13, 0.0 }
 0x2b1   :  { %v1373_v17 = vmul.f32 1.442695, %v1358_v14  ;;  %v1371_v18 = vmul.f32 1.442695, %v1357_v15  ;;  %1385 = vadd.xlane.f32.xlu0 %v1384_v16  ;;  %v2029_v14 = vld [vmem:[%s3984_s3 + $0x30] sm:$0xff] }
 0x2b2   :  { %v1492_v19 = vpop.permute.xlu0 %1491  ;;  %v1416_v20 = vpop.permute.xlu1 %1415 }
 0x2b3   :  { %3362 = vpow2.f32 %v1373_v17  ;;  %3234 = vmatpush3.msra.mxu0 %v1416_v20  ;;  %3239 = vmatpush3.msra.mxu1 %v1492_v19 }
 0x2b4   :  { %3364 = vpow2.f32 %v1371_v18  ;;  %3243 = vmatprep.subr.mxu0 %v3412_v2  ;;  %3248 = vmatprep.subr.mxu1 %v3412_v2 }
 0x2b6   :  { %v3359_v21 = vpop.eup %3358  ;;  %v1568_v29 = vpop.permute.xlu1 %1567 }
 0x2b7   :  { %v3361_v22 = vpop.eup %3360  ;;  %v1390_v23 = vsel %vm705_vm2, %v3359_v21, 0.0  ;;  %v1720_v32 = vpop.permute.xlu0 %1719 }
 0x2b8   :  { %1391 = vadd.xlane.f32.xlu0 %v1390_v23  ;;  %v1387_v24 = vsel %vm705_vm2, %v3361_v22, 0.0 }
 0x2b9   :  { %1388 = vadd.xlane.f32.xlu1 %v1387_v24 }
 0x2ba   :  { %v1644_v30 = vpop.permute.xlu1 %1643 }
 0x2be   :  { %v1796_v31 = vpop.permute.xlu1 %1795 }
 0x2c0   :  { %v3803_v25 = vpop.eup %3362 }
 0x2c1   :  { %v3805_v26 = vpop.eup %3364  ;;  %v1396_v27 = vsel %vm705_vm2, %v3803_v25, 0.0 }
 0x2c2   :  { %1397 = vadd.xlane.f32.xlu0 %v1396_v27  ;;  %v1393_v28 = vsel %vm705_vm2, %v3805_v26, 0.0 }
 0x2c3   :  { %1394 = vadd.xlane.f32.xlu1 %v1393_v28 }
 0x2d4   :  { %1947 = vrot.lane.b32.xlu1 %v3715_v0, %s3415_s2 }
 0x2d8   :  { %1871 = vrot.lane.b32.xlu0 %v3713_v63, %s3415_s2 }
 0x32c   :  { %v1377_v33 = vpop.xlane.xlu1 %1376 }
 0x32d   :  { %3366 = vrcp.f32 %v1377_v33 }
 0x330   :  { %v1380_v34 = vpop.xlane.xlu0 %1379 }
 0x331   :  { %3368 = vrcp.f32 %v1380_v34 }
 0x336   :  { %v1383_v35 = vpop.xlane.xlu1 %1382 }
 0x337   :  { %3370 = vrcp.f32 %v1383_v35 }
 0x33a   :  { %v3367_v36 = vpop.eup %3366  ;;  %v1386_v37 = vpop.xlane.xlu0 %1385 }
 0x33b   :  { %3372 = vrcp.f32 %v1386_v37  ;;  %v1407_v39 = vmul.f32 %v3367_v36, %v3351_v60  ;;  %v2024_v60 = vld [vmem:[%s3984_s3 + $0x8] sm:$0xff] }
 0x33d   :  { %3236 = vmatmul.mubr.msk.f32.vlgmr.msra.gmra.mxu0 %vm705_vm2, %v1407_v39 }
 0x33e   :  { %v3369_v0 = vpop.eup %3368  ;;  %3244 = vmatpush3.msra.mxu0 %v1568_v29  ;;  %3245 = vmatprep.mubr.msk.f32.mxu0 %vm3413_vm1, %v3412_v2 }
 0x33f   :  { %v1408_v63 = vmul.f32 %v3369_v0, %v3353_v62  ;;  %3253 = vmatprep.subr.mxu0 %v3412_v2  ;;  %v2026_v62 = vld [vmem:[%s3984_s3 + $0x18] sm:$0xff] }
 0x341   :  { %v1392_v40 = vpop.xlane.xlu0 %1391  ;;  %3241 = vmatmul.mubr.msk.f32.vlgmr.msra.gmra.mxu1 %vm705_vm2, %v1408_v63 }
 0x342   :  { %3374 = vrcp.f32 %v1392_v40  ;;  %v1389_v42 = vpop.xlane.xlu1 %1388  ;;  %3249 = vmatpush3.msra.mxu1 %v1644_v30  ;;  %3250 = vmatprep.mubr.msk.f32.mxu1 %vm3413_vm1, %v3412_v2 }
 0x343   :  { %3376 = vrcp.f32 %v1389_v42  ;;  %3258 = vmatprep.subr.mxu1 %v3412_v2 }
 0x344   :  { %v3371_v43 = vpop.eup %3370 }
 0x345   :  { %v1409_v44 = vmul.f32 %v3371_v43, %v3791_v7  ;;  %v2028_v7 = vld [vmem:[%s3984_s3 + $0x28] sm:$0xff] }
 0x347   :  { %3246 = vmatmul.mubr.msk.f32.vlgmr.msra.gmra.mxu0 %vm705_vm2, %v1409_v44 }
 0x348   :  { %v3373_v45 = vpop.eup %3372  ;;  %3254 = vmatpush3.msra.mxu0 %v1720_v32  ;;  %3255 = vmatprep.mubr.msk.f32.mxu0 %vm3413_vm1, %v3412_v2 }
 0x349   :  { %v1410_v47 = vmul.f32 %v3373_v45, %v3795_v13  ;;  %3263 = vmatprep.subr.mxu0 %v3412_v2  ;;  %v2990_v45 = vld [vmem:[%s3985_s4] ss:$0 sm:$0xff] }
 0x34b   :  { %v1398_v48 = vpop.xlane.xlu0 %1397  ;;  %3251 = vmatmul.mubr.msk.f32.vlgmr.msra.gmra.mxu1 %vm705_vm2, %v1410_v47 }
 0x34c   :  { %3378 = vrcp.f32 %v1398_v48  ;;  %v1395_v50 = vpop.xlane.xlu1 %1394  ;;  %3259 = vmatpush3.msra.mxu1 %v1796_v31  ;;  %3260 = vmatprep.mubr.msk.f32.mxu1 %vm3413_vm1, %v3412_v2 }
 0x34d   :  { %3380 = vrcp.f32 %v1395_v50  ;;  %3268 = vmatprep.subr.mxu1 %v3412_v2 }
 0x34f   :  { %v3375_v51 = vpop.eup %3374  ;;  %v1872_v46 = vpop.permute.xlu0 %1871 }
 0x350   :  { %v3377_v52 = vpop.eup %3376  ;;  %v1412_v53 = vmul.f32 %v3375_v51, %v3359_v21  ;;  %v1948_v54 = vpop.permute.xlu1 %1947 }
 0x351   :  { %v1411_v38 = vmul.f32 %v3377_v52, %v3361_v22 }
 0x352   :  { %3261 = vmatmul.mubr.msk.f32.vlgmr.msra.gmra.mxu1 %vm705_vm2, %v1412_v53 }
 0x353   :  { %3256 = vmatmul.mubr.msk.f32.vlgmr.msra.gmra.mxu0 %vm705_vm2, %v1411_v38  ;;  %3269 = vmatpush3.msra.mxu1 %v1948_v54 }
 0x354   :  { %3264 = vmatpush3.msra.mxu0 %v1872_v46  ;;  %3265 = vmatprep.mubr.msk.f32.mxu0 %vm3413_vm1, %v3412_v2 }
 0x355   :  { %3270 = vmatprep.mubr.msk.f32.mxu1 %vm3413_vm1, %v3412_v2  ;;  %3273 = vmatprep.subr.mxu0 %v3412_v2 }
 0x356   :  { %3278 = vmatprep.subr.mxu1 %v3412_v2 }
 0x359   :  { %v3379_v57 = vpop.eup %3378 }
 0x35a   :  { %v3381_v41 = vpop.eup %3380  ;;  %v1414_v58 = vmul.f32 %v3379_v57, %v3803_v25 }
 0x35b   :  { %v1413_v49 = vmul.f32 %v3381_v41, %v3805_v26 }
 0x35c   :  { %3271 = vmatmul.mubr.msk.f32.vlgmr.msra.gmra.mxu1 %vm705_vm2, %v1414_v58 }
 0x35d   :  { %3266 = vmatmul.mubr.msk.f32.vlgmr.msra.gmra.mxu0 %vm705_vm2, %v1413_v49  ;;  %3280 = vmatprep.mubr.msk.f32.mxu1 %vm3413_vm1, %v3412_v2 }
 0x35e   :  { %3275 = vmatprep.mubr.msk.f32.mxu0 %vm3413_vm1, %v3412_v2  ;;  %3274 = vmatpush3.msra.mxu0 %v2023_v59 }
 0x35f   :  { %3283 = vmatprep.subr.mxu0 %v3412_v2  ;;  %3279 = vmatpush3.msra.mxu1 %v2024_v60 }
 0x360   :  { %3288 = vmatprep.subr.mxu1 %v3412_v2 }
 0x3fd   :  { %v1487_v56 = vpop.f32.mrf.mxu0 }
 0x3fe   :  { %3276 = vmatmul.mubr.msk.f32.vlgmr.msra.gmra.mxu0 %vm705_vm2, %v1487_v56 }
 0x3ff   :  { %v3237_v61 = vpop.f32.mrf.mxu0  ;;  %3284 = vmatpush3.msra.mxu0 %v2025_v55  ;;  %3285 = vmatprep.mubr.msk.f32.mxu0 %vm3413_vm1, %v3412_v2 }
 0x400   :  { %3293 = vmatprep.subr.mxu0 %v3412_v2 }
 0x401   :  { %v1563_v1 = vpop.f32.mrf.mxu1 }
 0x402   :  { %3281 = vmatmul.mubr.msk.f32.vlgmr.msra.gmra.mxu1 %vm705_vm2, %v1563_v1 }
 0x403   :  { %v3242_v3 = vpop.f32.mrf.mxu1  ;;  %3289 = vmatpush3.msra.mxu1 %v2026_v62  ;;  %3290 = vmatprep.mubr.msk.f32.mxu1 %vm3413_vm1, %v3412_v2 }
 0x404   :  { %3298 = vmatprep.subr.mxu1 %v3412_v2 }
 0x407   :  { %v1639_v5 = vpop.f32.mrf.mxu0 }
 0x408   :  { %3286 = vmatmul.mubr.msk.f32.vlgmr.msra.gmra.mxu0 %vm705_vm2, %v1639_v5  ;;  %v2686_v5 = vld [vmem:[%s3988_s7 + $0x8] sm:$0xff] }
 0x409   :  { %v3247_v6 = vpop.f32.mrf.mxu0  ;;  %3294 = vmatpush3.msra.mxu0 %v2027_v4  ;;  %3295 = vmatprep.mubr.msk.f32.mxu0 %vm3413_vm1, %v3412_v2  ;;  %v2687_v4 = vld [vmem:[%s3988_s7 + $0x10] sm:$0xff] }
 0x40a   :  { %3303 = vmatprep.subr.mxu0 %v3412_v2  ;;  %v2685_v6 = vld [vmem:[%s3988_s7] sm:$0xff] }
 0x40b   :  { %v1715_v8 = vpop.f32.mrf.mxu1 }
 0x40c   :  { %3291 = vmatmul.mubr.msk.f32.vlgmr.msra.gmra.mxu1 %vm705_vm2, %v1715_v8  ;;  %v2785_v8 = vld [vmem:[%s3990_s9 + $0x30] sm:$0xff] }
 0x40d   :  { %v3252_v11 = vpop.f32.mrf.mxu1  ;;  %3299 = vmatpush3.msra.mxu1 %v2028_v7  ;;  %3300 = vmatprep.mubr.msk.f32.mxu1 %vm3413_vm1, %v3412_v2  ;;  %v2786_v7 = vld [vmem:[%s3990_s9 + $0x38] sm:$0xff] }
 0x40e   :  { %3308 = vmatprep.subr.mxu1 %v3412_v2  ;;  %v2784_v11 = vld [vmem:[%s3990_s9 + $0x28] sm:$0xff] }
 0x412   :  { %v1867_v13 = vpop.f32.mrf.mxu1 }
 0x413   :  { %v1791_v15 = vpop.f32.mrf.mxu0  ;;  %3301 = vmatmul.mubr.msk.f32.vlgmr.msra.gmra.mxu1 %vm705_vm2, %v1867_v13 }
 0x414   :  { %3296 = vmatmul.mubr.msk.f32.vlgmr.msra.gmra.mxu0 %vm705_vm2, %v1791_v15  ;;  %v3262_v16 = vpop.f32.mrf.mxu1  ;;  %3309 = vmatpush3.msra.mxu1 %v2030_v12  ;;  %v2783_v12 = vld [vmem:[%s3990_s9 + $0x20] sm:$0xff] }
 0x415   :  { %v3257_v17 = vpop.f32.mrf.mxu0  ;;  %3304 = vmatpush3.msra.mxu0 %v2029_v14  ;;  %3305 = vmatprep.mubr.msk.f32.mxu0 %vm3413_vm1, %v3412_v2 }
 0x416   :  { %3310 = vmatprep.mubr.msk.f32.mxu1 %vm3413_vm1, %v3412_v2  ;;  %3324 = vmatprep.subr.mxu1 %v2786_v7 }
 0x41c   :  { %v2019_v18 = vpop.f32.mrf.mxu1 }
 0x41d   :  { %v1943_v19 = vpop.f32.mrf.mxu0  ;;  %3311 = vmatmul.mubr.msk.f32.vlgmr.msra.gmra.mxu1 %vm705_vm2, %v2019_v18 }
 0x41e   :  { %3306 = vmatmul.mubr.msk.f32.vlgmr.msra.gmra.mxu0 %vm705_vm2, %v1943_v19  ;;  %v3272_v20 = vpop.f32.mrf.mxu1  ;;  %3325 = vmatpush3.msra.mxu1 %v2786_v7 }
 0x41f   :  { %v3267_v21 = vpop.f32.mrf.mxu0  ;;  %3326 = vmatprep.subr.mxu1 %v2785_v8  ;;  %v2991_v20 = vld [vmem:[%s3986_s5] ss:$0 sm:$0xff] }
 0x420   :  { %3327 = vmatpush3.msra.mxu1 %v2785_v8 }
 0x421   :  { %3328 = vmatprep.subr.mxu1 %v2784_v11 }
 0x422   :  { %3329 = vmatpush3.msra.mxu1 %v2784_v11 }
 0x423   :  { %3330 = vmatprep.subr.mxu1 %v2783_v12 }
 0x424   :  { %3331 = vmatpush3.msra.mxu1 %v2783_v12 }
 0x4be   :  { %v2100_v22 = vpop.f32.mrf.mxu0 }
 0x4bf   :  { %v2615_v37 = vsel %vm135_vm0, %v2100_v22, 0.0  ;;  %v2992_v22 = vld [vmem:[%s3987_s6] ss:$0 sm:$0xff] }
 0x4c0   :  { %v3277_v23 = vpop.f32.mrf.mxu0 }
 0x4c2   :  { %v2173_v24 = vpop.f32.mrf.mxu1 }
 0x4c3   :  { %v2622_v35 = vsel %vm135_vm0, %v2173_v24, 0.0 }
 0x4c4   :  { %v3282_v25 = vpop.f32.mrf.mxu1 }
 0x4c8   :  { %v2246_v26 = vpop.f32.mrf.mxu0 }
 0x4c9   :  { %v2616_v34 = vsel %vm135_vm0, %v2246_v26, 0.0 }
 0x4ca   :  { %v3287_v27 = vpop.f32.mrf.mxu0  ;;  %v2617_v63 = vadd.f32 %v2616_v34, %v2615_v37 }
 0x4cc   :  { %v2319_v28 = vpop.f32.mrf.mxu1 }
 0x4cd   :  { %v2623_v33 = vsel %vm135_vm0, %v2319_v28, 0.0 }
 0x4ce   :  { %v3292_v29 = vpop.f32.mrf.mxu1  ;;  %v2624_v39 = vadd.f32 %v2623_v33, %v2622_v35 }
 0x4cf   :  { %v2782_v29 = vld [vmem:[%s3990_s9 + $0x18] sm:$0xff] }
 0x4d0   :  { %3332 = vmatprep.subr.mxu1 %v2782_v29 }
 0x4d1   :  { %3333 = vmatpush3.msra.mxu1 %v2782_v29 }
 0x4d3   :  { %v2465_v30 = vpop.f32.mrf.mxu1 }
 0x4d4   :  { %v2392_v31 = vpop.f32.mrf.mxu0  ;;  %v2625_v36 = vsel %vm135_vm0, %v2465_v30, 0.0  ;;  %v2781_v30 = vld [vmem:[%s3990_s9 + $0x10] sm:$0xff] }
 0x4d5   :  { %v3302_v32 = vpop.f32.mrf.mxu1  ;;  %v2618_v0 = vsel %vm135_vm0, %v2392_v31, 0.0  ;;  %v2626_v40 = vadd.f32 %v2625_v36, %v2624_v39  ;;  %3334 = vmatprep.subr.mxu1 %v2781_v30  ;;  %v2780_v31 = vld [vmem:[%s3990_s9 + $0x8] sm:$0xff] }
 0x4d6   :  { %v3297_v2 = vpop.f32.mrf.mxu0  ;;  %v2619_v43 = vadd.f32 %v2618_v0, %v2617_v63  ;;  %3335 = vmatpush3.msra.mxu1 %v2781_v30  ;;  %v2779_v32 = vld [vmem:[%s3990_s9] sm:$0xff] }
 0x4d7   :  { %3336 = vmatprep.subr.mxu1 %v2780_v31  ;;  %v2993_v2 = vld [vmem:[%s3989_s8] ss:$0 sm:$0xff] }
 0x4d8   :  { %3337 = vmatpush3.msra.mxu1 %v2780_v31  ;;  %v2996_v0 = vld [vmem:[%s3991_s10] ss:$0 sm:$0xff] }
 0x4d9   :  { %3338 = vmatprep.subr.mxu1 %v2779_v32 }
 0x4da   :  { %3339 = vmatpush3.msra.mxu1 %v2779_v32 }
 0x4dd   :  { %v2611_v42 = vpop.f32.mrf.mxu1 }
 0x4de   :  { %v2538_v44 = vpop.f32.mrf.mxu0  ;;  %v2627_v47 = vsel %vm135_vm0, %v2611_v42, 0.0 }
 0x4df   :  { %v2620_v48 = vsel %vm135_vm0, %v2538_v44, 0.0  ;;  %v2628_v50 = vadd.f32 %v2627_v47, %v2626_v40  ;;  %v3312_v51 = vpop.f32.mrf.mxu1 }
 0x4e0   :  { %v2621_v52 = vadd.f32 %v2620_v48, %v2619_v43  ;;  %v3307_v53 = vpop.f32.mrf.mxu0 }
 0x4e1   :  { %v2637_v38 = vadd.f32 %v2990_v45, %v2628_v50 }
 0x4e2   :  { %v2636_v54 = vadd.f32 %v2990_v45, %v2621_v52 }
 0x4e3   :  { %v2639_v46 = vadd.f32 %v2637_v38, %v3531_v10 }
 0x4e4   :  { %v2638_v57 = vadd.f32 %v2636_v54, %v3522_v9  ;;  %v2688_v9 = vld [vmem:[%s3988_s7 + $0x18] sm:$0xff] }
 0x4e5   :  { %v2645_v41 = vsel %vm135_vm0, %v2639_v46, 0.0  ;;  %3313 = vmatprep.subr.mxu0 %v2688_v9 }
 0x4e6   :  { %2646 = vadd.xlane.f32.xlu1 %v2645_v41  ;;  %v2642_v58 = vsel %vm135_vm0, %v2638_v57, 0.0  ;;  %3314 = vmatpush3.msra.mxu0 %v2688_v9 }
 0x4e7   :  { %2643 = vadd.xlane.f32.xlu0 %v2642_v58  ;;  %3315 = vmatprep.subr.mxu0 %v2687_v4 }
 0x4e8   :  { %3316 = vmatpush3.msra.mxu0 %v2687_v4 }
 0x4e9   :  { %3317 = vmatprep.subr.mxu0 %v2686_v5 }
 0x4ea   :  { %3318 = vmatpush3.msra.mxu0 %v2686_v5  ;;  %v3000_v5 = vld [vmem:[%s3993_s12] ss:$0 sm:$0xff] }
 0x4eb   :  { %3319 = vmatprep.subr.mxu0 %v2685_v6 }
 0x4ec   :  { %3320 = vmatpush3.msra.mxu0 %v2685_v6 }
 0x56f   :  { %v2647_v49 = vpop.xlane.xlu1 %2646 }
 0x570   :  { %v2650_v59 = vmul.f32 0.03125, %v2647_v49  ;;  %v2644_v60 = vpop.xlane.xlu0 %2643 }
 0x571   :  { %v2649_v55 = vmul.f32 0.03125, %v2644_v60 }
 0x572   :  { %v2652_v56 = vsub.f32 %v2639_v46, %v2650_v59 }
 0x573   :  { %v2651_v61 = vsub.f32 %v2638_v57, %v2649_v55 }
 0x574   :  { %v2654_v3 = vmul.f32 %v2652_v56, %v2652_v56 }
 0x575   :  { %v2653_v62 = vmul.f32 %v2651_v61, %v2651_v61 }
 0x576   :  { %v2658_v10 = vsel %vm135_vm0, %v2654_v3, 0.0 }
 0x577   :  { %v2655_v1 = vsel %vm135_vm0, %v2653_v62, 0.0 }
 0x578   :  { %2656 = vadd.xlane.f32.xlu0 %v2655_v1 }
 0x57c   :  { %2659 = vadd.xlane.f32.xlu0 %v2658_v10  ;;  %v2999_v10 = vld [vmem:[%s3992_s11] ss:$0 sm:$0xff] }
 0x601   :  { %v2657_v13 = vpop.xlane.xlu0 %2656 }
 0x602   :  { %v2661_v14 = vmul.f32 0.03125, %v2657_v13 }
 0x604   :  { %v2663_v15 = vadd.f32 1e-05, %v2661_v14 }
 0x605   :  { %v2660_v16 = vpop.xlane.xlu0 %2659 }
 0x606   :  { %3382 = vrsqrt.f32 %v2663_v15  ;;  %v2662_v17 = vmul.f32 0.03125, %v2660_v16 }
 0x608   :  { %v2664_v18 = vadd.f32 1e-05, %v2662_v17 }
 0x60a   :  { %3384 = vrsqrt.f32 %v2664_v18 }
 0x613   :  { %v3383_v19 = vpop.eup %3382 }
 0x614   :  { %v2667_v21 = vmul.f32 %v3383_v19, %v2651_v61 }
 0x616   :  { %v2675_v23 = vmul.f32 %v2991_v20, %v2667_v21 }
 0x617   :  { %v3385_v24 = vpop.eup %3384 }
 0x618   :  { %v2668_v25 = vmul.f32 %v3385_v24, %v2652_v56  ;;  %v2683_v26 = vadd.f32 %v2992_v22, %v2675_v23 }
 0x61a   :  { %v2676_v27 = vmul.f32 %v2991_v20, %v2668_v25  ;;  %3321 = vmatprep.mubr.msk.f32.mxu0 %vm135_vm0, %v2683_v26 }
 0x61c   :  { %v2684_v28 = vadd.f32 %v2992_v22, %v2676_v27 }
 0x61e   :  { %3322 = vmatmul.mubr.msk.f32.vlgmr.msra.gmra.mxu0 %vm135_vm0, %v2684_v28 }
 0x6de   :  { %v3323_v33 = vpop.f32.mrf.mxu0 }
 0x6df   :  { %v2774_v34 = vadd.f32 %v3323_v33, %v2993_v2 }
 0x6e0   :  { %v2768_v35 = vpop.f32.mrf.mxu0 }
 0x6e1   :  { %v2769_v36 = vadd.f32 %v2993_v2, %v2768_v35  ;;  %v2778_v39 = vmax.f32 %v2774_v34, 0.0 }
 0x6e3   :  { %v2777_v37 = vmax.f32 %v2769_v36, 0.0 }
 0x6e5   :  { %3340 = vmatprep.mubr.msk.f32.mxu1 %vm2794_vm3, %v2777_v37 }
 0x6e6   :  { %3341 = vmatmul.mubr.msk.f32.vlgmr.msra.gmra.mxu1 %vm2794_vm3, %v2778_v39 }
 0x7a6   :  { %v3342_v63 = vpop.f32.mrf.mxu1 }
 0x7a7   :  { %v2873_v40 = vadd.f32 %v3342_v63, %v2996_v0 }
 0x7a8   :  { %v2867_v42 = vpop.f32.mrf.mxu1 }
 0x7a9   :  { %v2877_v43 = vmax.f32 %v2873_v40, 0.0  ;;  %v2868_v44 = vadd.f32 %v2996_v0, %v2867_v42 }
 0x7ab   :  { %v2876_v45 = vmax.f32 %v2868_v44, 0.0  ;;  %v2879_v47 = vadd.f32 %v2877_v43, %v2684_v28 }
 0x7ad   :  { %v2885_v48 = vsel %vm135_vm0, %v2879_v47, 0.0  ;;  %v2878_v50 = vadd.f32 %v2876_v45, %v2683_v26 }
 0x7ae   :  { %2886 = vadd.xlane.f32.xlu0 %v2885_v48 }
 0x7af   :  { %v2882_v51 = vsel %vm135_vm0, %v2878_v50, 0.0 }
 0x7b0   :  { %2883 = vadd.xlane.f32.xlu1 %v2882_v51 }
 0x837   :  { %v2887_v52 = vpop.xlane.xlu0 %2886 }
 0x838   :  { %v2889_v53 = vmul.f32 0.03125, %v2887_v52 }
 0x839   :  { %v2884_v38 = vpop.xlane.xlu1 %2883 }
 0x83a   :  { %v2891_v54 = vsub.f32 %v2879_v47, %v2889_v53  ;;  %v2888_v46 = vmul.f32 0.03125, %v2884_v38 }
 0x83c   :  { %v2890_v57 = vsub.f32 %v2878_v50, %v2888_v46  ;;  %v2893_v41 = vmul.f32 %v2891_v54, %v2891_v54 }
 0x83e   :  { %v2897_v58 = vsel %vm135_vm0, %v2893_v41, 0.0  ;;  %v2892_v49 = vmul.f32 %v2890_v57, %v2890_v57 }
 0x83f   :  { %2898 = vadd.xlane.f32.xlu0 %v2897_v58 }
 0x840   :  { %v2894_v59 = vsel %vm135_vm0, %v2892_v49, 0.0 }
 0x841   :  { %2895 = vadd.xlane.f32.xlu1 %v2894_v59 }
 0x8c8   :  { %v2899_v60 = vpop.xlane.xlu0 %2898 }
 0x8c9   :  { %v2901_v55 = vmul.f32 0.03125, %v2899_v60 }
 0x8ca   :  { %v2896_v56 = vpop.xlane.xlu1 %2895 }
 0x8cb   :  { %v2903_v61 = vadd.f32 1e-05, %v2901_v55  ;;  %v2900_v62 = vmul.f32 0.03125, %v2896_v56 }
 0x8cd   :  { %3386 = vrsqrt.f32 %v2903_v61  ;;  %v2902_v1 = vadd.f32 1e-05, %v2900_v62 }
 0x8cf   :  { %3388 = vrsqrt.f32 %v2902_v1 }
 0x8da   :  { %v3387_v3 = vpop.eup %3386 }
 0x8db   :  { %v2907_v9 = vmul.f32 %v3387_v3, %v2891_v54 }
 0x8dc   :  { %v3389_v4 = vpop.eup %3388 }
 0x8dd   :  { %v2906_v6 = vmul.f32 %v3389_v4, %v2890_v57  ;;  %v2915_v7 = vmul.f32 %v2999_v10, %v2907_v9 }
 0x8df   :  { %v2914_v8 = vmul.f32 %v2999_v10, %v2906_v6  ;;  %v2923_v11 = vadd.f32 %v3000_v5, %v2915_v7 }
 0x8e1   :  { %v2922_v12 = vadd.f32 %v3000_v5, %v2914_v8  ;;  %2925 = vst.msk [vmem:[#allocation2 + $0x8] sm:$0xff] %vm135_vm0, %v2923_v11 }
 0x8e3   :  { %2924 = vst.msk [vmem:[#allocation2] sm:$0xff] %vm135_vm0, %v2922_v12 }
 0x8e4   :  { %3401 = shalt.err (!%p3398_p4)
}
 0x8e5   :  { %s3417_s11 = smov 128   ;;  %s3418_s12 = smov 8  }
 0x8e6   :  { %2937 = dma.vmem_to_hbm [thread:$0]  %s2932_s24, 256, %s3994_s13, [#allocation3], %s3417_s11, %s3417_s11, %s3418_s12  }
 0x8e7   :  { %3410 = dma.done.wait [#allocation3], 256  }
 0x8e8   :  { %3411 = vsyncadd [#allocation3], 4294967040 }
 0x8e9   :  { %2941 = vsyncpa [#allocation3], 1 }

</bundles_post_ra>
